<compile_context>
chip_gen: v7x
topology: tpu7x:2x2x1
jax: 0.10.0
libtpu: 0.0.40
codegen_flags: <defaults>
</compile_context>

<pallas_src>
import math

import jax
import jax.numpy as jnp
from jax.experimental import pallas as pl
from jax.experimental.pallas import tpu as pltpu


def _ceil_div(a, b):
    return -(-a // b)


def _round_up(a, m):
    return _ceil_div(a, m) * m


def _symplectic_update_kernel(x_ref, y_ref, a_ref, out_ref):
    # x_ref/y_ref: (tb, Dv) VMEM tiles; a_ref: (1, Dv) f32 with dt**power already folded in.
    x = x_ref[...].astype(jnp.float32)
    y = y_ref[...].astype(jnp.float32)
    out_ref[...] = (y + jax.nn.sigmoid(x) * a_ref[...]).astype(out_ref.dtype)


def _chip_info():
    """(num_tensorcores_per_device, vmem_working_set_budget_bytes) with safe fallbacks."""
    num_tc, budget = 2, 12 * 1024 * 1024          # conservative defaults for unknown chips
    try:
        kind = jax.devices()[0].device_kind.lower().replace(" ", "")
        if any(s in kind for s in ("v5lite", "v5e", "v6lite", "v6e", "v2", "v3")):
            num_tc, budget = 1, 24 * 1024 * 1024  # single TC per device, 128 MiB physical VMEM
        elif "v7" in kind:
            num_tc, budget = 2, 14 * 1024 * 1024  # 2 TCs per chip, 64 MiB physical VMEM
        else:                                     # v4 / v5p megacore and anything newer
            num_tc, budget = 2, 20 * 1024 * 1024
    except Exception:
        pass
    return num_tc, budget


def _pick_tile_rows(rows, lane_cols, itemsize, num_tc, budget_bytes):
    """Batch-tile size: as big as the VMEM budget allows; on 2-TC chips keep an even,
    balanced number of grid steps so the 'parallel' axis shards across both cores."""
    per_row = 3 * 2 * lane_cols * itemsize        # x, y, out — each double-buffered
    tb_budget = max(8, (budget_bytes // per_row) // 8 * 8)
    tb_budget = min(tb_budget, 8192)
    rows_pad = _round_up(rows, 8)
    if num_tc >= 2 and rows_pad >= 16:
        n_steps = max(2, _ceil_div(rows_pad, tb_budget))
        if n_steps % 2:
            n_steps += 1                          # even step count -> balanced core split
        tb = _round_up(_ceil_div(rows_pad, n_steps), 8)
    else:
        tb = min(tb_budget, rows_pad)             # single TC: one big tile, no halving
    return max(min(tb, rows_pad), 8)


def _lane_dense_layout(B, D):
    """Return (g, D_view): flatten g rows into one lane-dense row (g>1, D_view=g*D),
    or zero-pad the last dim to a multiple of 128 (g=1, D_view>=D)."""
    if D % 128 == 0:
        return 1, D
    g = 128 // math.gcd(D, 128)                   # smallest g with (g*D) % 128 == 0
    if g > 1 and B % g == 0:
        return g, g * D
    return 1, _round_up(D, 128)


def symplectic_activation(q, p, a, dt, *, mode="up", power=2, tb=None, alias_update=False):
    """q, p: (B, D); a: (D,); dt: scalar. Returns (q_out, p_out).
    Only the updated tensor passes through the kernel; the other is returned as-is.
    Set alias_update=True (and donate the updated tensor under jit) for an in-place update."""
    assert mode in ("up", "low")
    B, D = q.shape
    # 'up': p <- p + sigmoid(q)*a*dt**power ;  'low': q <- q + sigmoid(p)*a*dt**power
    x, y = (q, p) if mode == "up" else (p, q)
    out_dtype = y.dtype

    # Fold dt**power into the parameter once (drops the SMEM scalar + one vmul per vreg).
    a_scaled = (a.astype(jnp.float32) * jnp.asarray(dt, jnp.float32) ** power).reshape(1, D)

    # Guarantee a lane-dense (multiple-of-128) last dim for unmasked stores / wide DMAs.
    g, D_v = _lane_dense_layout(B, D)
    if g > 1:
        x_v = x.reshape(B // g, D_v)
        y_v = y.reshape(B // g, D_v)
        a_v = jnp.tile(a_scaled, (1, g))
    elif D_v != D:
        pad = D_v - D
        x_v = jnp.pad(x, ((0, 0), (0, pad)))
        y_v = jnp.pad(y, ((0, 0), (0, pad)))
        a_v = jnp.pad(a_scaled, ((0, 0), (0, pad)))
    else:
        x_v, y_v, a_v = x, y, a_scaled

    Bv, Dv = x_v.shape
    num_tc, budget = _chip_info()
    if tb is None:
        tb = _pick_tile_rows(Bv, Dv, jnp.dtype(out_dtype).itemsize, num_tc, budget)

    out = pl.pallas_call(
        _symplectic_update_kernel,
        out_shape=jax.ShapeDtypeStruct((Bv, Dv), out_dtype),
        grid=(pl.cdiv(Bv, tb),),
        in_specs=[
            pl.BlockSpec((tb, Dv), lambda i: (i, 0)),   # x (sigmoid input)
            pl.BlockSpec((tb, Dv), lambda i: (i, 0)),   # y (updated variable)
            pl.BlockSpec((1, Dv), lambda i: (0, 0)),    # a * dt**power, broadcast over batch
        ],
        out_specs=pl.BlockSpec((tb, Dv), lambda i: (i, 0)),
        input_output_aliases=({1: 0} if alias_update else {}),
        compiler_params=pltpu.CompilerParams(
            dimension_semantics=("parallel",),
            vmem_limit_bytes=32 * 1024 * 1024,
        ),
    )(x_v, y_v, a_v)

    if g > 1:
        out = out.reshape(B, D)
    elif D_v != D:
        out = out[:, :D]

    return (q, out) if mode == "up" else (out, p)


def _reference(q, p, a, dt, mode, power):
    scale = dt ** power
    if mode == "up":
        return q, p + jax.nn.sigmoid(q) * a[None, :] * scale
    else:
        return q + jax.nn.sigmoid(p) * a[None, :] * scale, p


if __name__ == "__main__":
    key = jax.random.PRNGKey(0)
    k_q, k_p, k_a = jax.random.split(key, 3)

    power = 2
    dt = jnp.float32(0.1)

    ok = True
    # (8, 128)  : model_args['input_dim']=256 -> d=128 (lane-dense fast path)
    # (264, 128): batch not a multiple of the tile -> partial last block
    # (8, 96)   : D % 128 != 0, B % g == 0       -> lane-dense flatten path
    # (10, 100) : D % 128 != 0, B % 8 != 0       -> pad path + ragged batch
    for batch, d in [(8, 128), (264, 128), (8, 96), (10, 100)]:
        q = jax.random.normal(k_q, (batch, d), dtype=jnp.float32)
        p = jax.random.normal(k_p, (batch, d), dtype=jnp.float32)
        a = jax.random.normal(k_a, (d,), dtype=jnp.float32) * 0.01  # nn.Parameter(randn(d)*0.01)

        for mode in ("up", "low"):
            q_out, p_out = symplectic_activation(q, p, a, dt, mode=mode, power=power)
            jax.block_until_ready((q_out, p_out))
            q_ref, p_ref = _reference(q, p, a, dt, mode, power)
            ok &= bool(jnp.allclose(q_out, q_ref, atol=1e-5, rtol=1e-5))
            ok &= bool(jnp.allclose(p_out, p_ref, atol=1e-5, rtol=1e-5))

    # In-place path: aliased output + donated updated tensor (typical integrator-loop usage).
    q2 = jax.random.normal(k_q, (32, 128), dtype=jnp.float32)
    p2 = jax.random.normal(k_p, (32, 128), dtype=jnp.float32)
    a2 = jax.random.normal(k_a, (128,), dtype=jnp.float32) * 0.01
    q_ref2, p_ref2 = _reference(q2, p2, a2, dt, "up", power)
    step = jax.jit(
        lambda q_, p_, a_, dt_: symplectic_activation(
            q_, p_, a_, dt_, mode="up", power=power, alias_update=True),
        donate_argnums=(1,),
    )
    q_out2, p_out2 = step(q2, p2, a2, dt)
    jax.block_until_ready((q_out2, p_out2))
    ok &= bool(jnp.allclose(q_out2, q_ref2, atol=1e-5, rtol=1e-5))
    ok &= bool(jnp.allclose(p_out2, p_ref2, atol=1e-5, rtol=1e-5))

    print("KERNEL_OK" if ok else "KERNEL_MISMATCH")
</pallas_src>

<mosaic_0001>
module attributes {stable_mosaic.version = 11 : i64} {
  func.func @_symplectic_update_kernel(%arg0: i32, %arg1: memref<8x128xf32, #tpu.memory_space<vmem>>, %arg2: memref<8x128xf32, #tpu.memory_space<vmem>>, %arg3: memref<1x128xf32, #tpu.memory_space<vmem>>, %arg4: memref<8x128xf32, #tpu.memory_space<vmem>>) attributes {dimension_semantics = [#tpu.dimension_semantics<parallel>], iteration_bounds = array<i64: 1>, scalar_prefetch = 0 : i64, scratch_operands = 0 : i64, tpu.core_type = #tpu.core_type<tc>, window_params = [{transform_indices = @transform_0, window_bounds = array<i64: 8, 128>}, {transform_indices = @transform_1, window_bounds = array<i64: 8, 128>}, {pipeline_mode = #tpu.pipeline_mode<synchronous>, transform_indices = @transform_2, window_bounds = array<i64: 1, 128>}, {transform_indices = @transform_3, window_bounds = array<i64: 8, 128>}]} {
    %c0 = arith.constant 0 : index
    %c0_0 = arith.constant 0 : index
    %0 = vector.load %arg1[%c0, %c0_0] : memref<8x128xf32, #tpu.memory_space<vmem>>, vector<8x128xf32>
    %c0_1 = arith.constant 0 : index
    %c0_2 = arith.constant 0 : index
    %1 = vector.load %arg2[%c0_1, %c0_2] : memref<8x128xf32, #tpu.memory_space<vmem>>, vector<8x128xf32>
    %2 = arith.negf %0 : vector<8x128xf32>
    %3 = math.exp %2 : vector<8x128xf32>
    %cst = arith.constant 1.000000e+00 : f32
    %4 = vector.broadcast %cst : f32 to vector<8x128xf32>
    %5 = arith.addf %4, %3 : vector<8x128xf32>
    %6 = arith.divf %4, %5 : vector<8x128xf32>
    %c0_3 = arith.constant 0 : index
    %c0_4 = arith.constant 0 : index
    %7 = vector.load %arg3[%c0_3, %c0_4] : memref<1x128xf32, #tpu.memory_space<vmem>>, vector<1x128xf32>
    %8 = vector.broadcast %7 : vector<1x128xf32> to vector<8x128xf32>
    %9 = arith.mulf %6, %8 : vector<8x128xf32>
    %10 = arith.addf %1, %9 : vector<8x128xf32>
    %c0_5 = arith.constant 0 : index
    %c0_6 = arith.constant 0 : index
    %11 = vector.load %arg4[%c0_5, %c0_6] : memref<8x128xf32, #tpu.memory_space<vmem>>, vector<8x128xf32>
    tpu.vector_store %arg4[%c0_5, %c0_6], %10 {strides = array<i32>} : memref<8x128xf32, #tpu.memory_space<vmem>>, vector<8x128xf32>,
    return
  }
  func.func @transform_0(%arg0: i32) -> (i32, i32) {
    %c0_i32 = arith.constant 0 : i32
    %c0_i32_0 = arith.constant 0 : i32
    return %arg0, %c0_i32 : i32, i32
  }
  func.func @transform_1(%arg0: i32) -> (i32, i32) {
    %c0_i32 = arith.constant 0 : i32
    %c0_i32_0 = arith.constant 0 : i32
    return %arg0, %c0_i32 : i32, i32
  }
  func.func @transform_2(%arg0: i32) -> (i32, i32) {
    %c0_i32 = arith.constant 0 : i32
    %c0_i32_0 = arith.constant 0 : i32
    %c0_i32_1 = arith.constant 0 : i32
    return %c0_i32, %c0_i32_0 : i32, i32
  }
  func.func @transform_3(%arg0: i32) -> (i32, i32) {
    %c0_i32 = arith.constant 0 : i32
    %c0_i32_0 = arith.constant 0 : i32
    return %arg0, %c0_i32 : i32, i32
  }
}

</mosaic_0001>

<bundles_post_ra>
// kernel: tpu_custom_call.1
= control target key start
LH: loop header
LB: loop body
LE: loop exit
PB: predicated region body
PF: predicated region fallthrough
CT: control target
= control target key end

     0   :  { %8 = vsyncpa [#allocation3], 0  ;;  %s216_s0 = inlined_call_operand.hbm [shape: f32[8,128], index: 0, kind: input, shape index: {}]   ;;  %s217_s1 = inlined_call_operand.hbm [shape: f32[8,128], index: 1, kind: input, shape index: {}]   ;;  %s218_s2 = inlined_call_operand.vmem [shape: f32[1,128], index: 2, kind: input, shape index: {}]   ;;  %s219_s3 = inlined_call_operand.hbm [shape: f32[8,128], index: 3, kind: output, shape index: {}]  }
   0x1   :  { %9 = vsyncpa [#allocation6], 0 }
   0x2   :  { %10 = vsyncpa [#allocation4], 0  ;;  %s154_s12 = smov [#allocation2]   ;;  %s155_s14 = smov [#allocation5]  }
   0x3   :  { %s17_s13 = sshll.u32 %s154_s12, 4  ;;  %s27_s15 = sshll.u32 %s155_s14, 4  ;;  %s18_s13 = int_to_ptr.vmem [resolvable:$true] %s17_s13  ;;  %s28_s15 = int_to_ptr.vmem [resolvable:$true] %s27_s15 }
   0x4   :  { %s82_s18 = scalar_lea.hbm %s216_s0, 128 }
   0x5   :  { %p83_p0 = scmp.ne.s32.totalorder %s216_s0, %s82_s18  ;;  %p86_p1 = scmp.lt.u32.totalorder %s82_s18, %s216_s0 }
   0x7   :  { %p88_p2 = pnand %p86_p1, %p83_p0 }
   0x9   :  { %91 = shalt.err (!%p88_p2)
}
   0xa   :  { %s92_s23 = scalar_lea.vmem %s18_s13, 128  ;;  %p97_p4 = scmp.lt.s32.totalorder %s18_s13, %s18_s13 }
   0xb   :  { %p93_p3 = scmp.ne.s32.totalorder %s18_s13, %s92_s23  ;;  %p98_p5 = scmp.lt.s32.totalorder %s92_s23, %s92_s23 }
   0xd   :  { %p99_p6 = por %p98_p5, %p97_p4 }
   0xf   :  { %p100_p7 = pnand %p99_p6, %p93_p3 }
  0x11   :  { %103 = shalt.err (!%p100_p7)
}
  0x12   :  { %20 = dma.hbm_to_vmem [thread:$0]  %s216_s0, 128, %s18_s13, [#allocation3]  }
  0x13   :  { %s104_s28 = scalar_lea.hbm %s217_s1, 128 }
  0x14   :  { %p105_p8 = scmp.ne.s32.totalorder %s217_s1, %s104_s28  ;;  %p108_p9 = scmp.lt.u32.totalorder %s104_s28, %s217_s1 }
  0x16   :  { %p110_p10 = pnand %p108_p9, %p105_p8 }
  0x18   :  { %113 = shalt.err (!%p110_p10)
}
  0x19   :  { %s114_s6 = scalar_lea.vmem %s28_s15, 128  ;;  %p119_p12 = scmp.lt.s32.totalorder %s28_s15, %s28_s15 }
  0x1a   :  { %p115_p11 = scmp.ne.s32.totalorder %s28_s15, %s114_s6  ;;  %p120_p13 = scmp.lt.s32.totalorder %s114_s6, %s114_s6 }
  0x1c   :  { %p121_p0 = por %p120_p13, %p119_p12 }
  0x1e   :  { %p122_p1 = pnand %p121_p0, %p115_p11 }
  0x20   :  { %125 = shalt.err (!%p122_p1)
}
  0x21   :  { %30 = dma.hbm_to_vmem [thread:$0]  %s217_s1, 128, %s28_s15, [#allocation6]  }
  0x22   :  { %148 = dma.done.wait [#allocation3], 128  }
  0x23   :  { %149 = vsyncadd [#allocation3], 4294967168 }
  0x24   :  { %150 = dma.done.wait [#allocation6], 128  }
  0x25   :  { %151 = vsyncadd [#allocation6], 4294967168  ;;  %v39_v0 = vld [vmem:[#allocation2] sm:$0xff]  ;;  %v40_v6 = vld [vmem:[#allocation5] sm:$0xff]  ;;  %s156_s10 = smov [#allocation7]  }
  0x26   :  { %v73_v1 = vmul.f32 -1.442695, %v39_v0  ;;  %v74_v4 = vld [vmem:[%s218_s2] ss:$0 sm:$0xff]  ;;  %s63_s11 = sshll.u32 %s156_s10, 4  ;;  %s64_s11 = int_to_ptr.vmem [resolvable:$true] %s63_s11 }
  0x27   :  { %s126_s1 = scalar_lea.vmem %s64_s11, 128  ;;  %p131_p3 = scmp.lt.s32.totalorder %s64_s11, %s64_s11 }
  0x28   :  { %78 = vpow2.f32 %v73_v1  ;;  %p127_p2 = scmp.ne.s32.totalorder %s64_s11, %s126_s1  ;;  %p132_p4 = scmp.lt.s32.totalorder %s126_s1, %s126_s1 }
  0x2a   :  { %p133_p5 = por %p132_p4, %p131_p3 }
  0x2c   :  { %p134_p6 = pnand %p133_p5, %p127_p2 }
  0x32   :  { %v79_v2 = vpop.eup %78 }
  0x33   :  { %v44_v3 = vadd.f32 1.0, %v79_v2 }
  0x35   :  { %80 = vrcp.f32 %v44_v3 }
  0x3f   :  { %v81_v5 = vpop.eup %80 }
  0x40   :  { %v54_v7 = vmul.f32 %v81_v5, %v74_v4 }
  0x42   :  { %v55_v8 = vadd.f32 %v54_v7, %v40_v6 }
  0x44   :  { %56 = vst [vmem:[#allocation7] sm:$0xff] %v55_v8 }
  0x45   :  { %137 = shalt.err (!%p134_p6)
}
  0x46   :  { %s138_s14 = scalar_lea.hbm %s219_s3, 128 }
  0x47   :  { %p139_p7 = scmp.ne.s32.totalorder %s219_s3, %s138_s14  ;;  %p142_p8 = scmp.lt.u32.totalorder %s138_s14, %s219_s3 }
  0x49   :  { %p144_p9 = pnand %p142_p8, %p139_p7 }
  0x4b   :  { %147 = shalt.err (!%p144_p9)
}
  0x4c   :  { %66 = dma.vmem_to_hbm [thread:$0]  %s64_s11, 128, %s219_s3, [#allocation4]  }
  0x4d   :  { %152 = dma.done.wait [#allocation4], 128  }
  0x4e   :  { %153 = vsyncadd [#allocation4], 4294967168 }
  0x4f   :  { %70 = vsyncpa [#allocation3], 1 }
  0x50   :  { %71 = vsyncpa [#allocation6], 1 }
  0x51   :  { %72 = vsyncpa [#allocation4], 1 }

</bundles_post_ra>
